<compile_context>
chip_gen: v6e
topology: v6e:2x2x1
jax: 0.10.0
libtpu: 0.0.40
codegen_flags: <defaults>
</compile_context>

<pallas_src>
import functools

import jax
import jax.numpy as jnp
from jax.experimental import pallas as pl
from jax.experimental.pallas import tpu as pltpu

LANE = 128     # vreg lane width (last dim)
SUBLANE = 8    # vreg sublane width (second-to-last dim)


def _round_up(n, m):
    return ((n + m - 1) // m) * m


def _pad_to(a, shape):
    pads = [(0, t - s) for s, t in zip(a.shape, shape)]
    return jnp.pad(a, pads)


def _vmem_capacity_bytes():
    """Physical VMEM per TensorCore; conservative fallback = v7x (64 MiB)."""
    try:
        cap = getattr(pltpu.get_tpu_info(), "vmem_capacity_bytes", None)
        if cap:
            return int(cap)
    except Exception:
        pass
    return 64 << 20


def _mlp_kernel(x_ref, w1_ref, b1_ref, w2_ref, b2_ref, w3_ref, b3_ref, o_ref):
    wdt = w1_ref.dtype   # MXU operand dtype (f32 or bf16); accumulation is f32.
    x = x_ref[...].astype(wdt)

    # Layer 1: Linear(input_dim -> input_dim // 2) + ReLU
    h1 = jnp.dot(x, w1_ref[...], preferred_element_type=jnp.float32) + b1_ref[...]
    h1 = jnp.maximum(h1, 0.0)

    # Layer 2: Linear(input_dim // 2 -> input_dim // 4) + ReLU
    h2 = jnp.dot(h1.astype(wdt), w2_ref[...],
                 preferred_element_type=jnp.float32) + b2_ref[...]
    h2 = jnp.maximum(h2, 0.0)

    # Layer 3: Linear(input_dim // 4 -> output_dim), no activation
    out = jnp.dot(h2.astype(wdt), w3_ref[...],
                  preferred_element_type=jnp.float32) + b3_ref[...]
    o_ref[...] = out.astype(o_ref.dtype)


def prepare_params(params, dtype=jnp.float32):
    """One-time prep: transpose PyTorch (out,in) weights to (in,out) and pad
    only the *hidden* dims up to a multiple of 128. Input / output feature
    dims stay at native width so the HBM-facing x / out streams are never
    inflated. Zero padding is exact (padded weight cols & biases are 0,
    ReLU(0)=0). dtype=jnp.bfloat16 selects the half-bandwidth MXU-operand path
    (v6e/v7x); biases stay f32 (added to the f32 accumulator)."""
    w1, w2, w3 = params["w1"], params["w2"], params["w3"]
    b1, b2, b3 = params["b1"], params["b2"], params["b3"]
    in_dim, h1, h2, out_dim = w1.shape[1], w1.shape[0], w2.shape[0], w3.shape[0]
    h1_p, h2_p = _round_up(h1, LANE), _round_up(h2, LANE)
    return {
        "w1": _pad_to(w1.T, (in_dim, h1_p)).astype(dtype),
        "b1": _pad_to(b1.reshape(1, -1), (1, h1_p)).astype(jnp.float32),
        "w2": _pad_to(w2.T, (h1_p, h2_p)).astype(dtype),
        "b2": _pad_to(b2.reshape(1, -1), (1, h2_p)).astype(jnp.float32),
        "w3": _pad_to(w3.T, (h2_p, out_dim)).astype(dtype),
        "b3": b3.reshape(1, -1).astype(jnp.float32),
    }


@functools.partial(jax.jit, static_argnames=("max_tile_b", "min_grid_steps"))
def mlp_forward(x, prep, *, max_tile_b=1024, min_grid_steps=4):
    """x: (..., input_dim). prep: output of prepare_params."""
    w1, b1 = prep["w1"], prep["b1"]
    w2, b2 = prep["w2"], prep["b2"]
    w3, b3 = prep["w3"], prep["b3"]
    in_dim = w1.shape[0]
    h1_p, h2_p = w1.shape[1], w2.shape[1]
    out_dim = w3.shape[1]

    assert x.shape[-1] == in_dim, "input feature dim mismatch"
    lead_shape = x.shape[:-1]
    x2 = x.reshape(-1, in_dim)
    B = x2.shape[0]

    # Batch tile: aim for >= min_grid_steps grid steps (megacore sharding +
    # DMA/compute overlap), capped at max_tile_b; for tiny batches use one
    # block spanning the whole (possibly non-multiple-of-8) batch.
    tile_b = min(max_tile_b, _round_up(pl.cdiv(B, min_grid_steps), SUBLANE))
    if tile_b >= B:
        tile_b = B
    grid = (pl.cdiv(B, tile_b),)

    # VMEM budget: double-buffered x/out tiles + (double-buffered) resident
    # weights + intermediate activations, clamped to the device capacity.
    itemsize_x = x2.dtype.itemsize
    weight_bytes = sum(int(a.size) * a.dtype.itemsize
                       for a in (w1, b1, w2, b2, w3, b3))
    io_bytes = 2 * tile_b * (in_dim + out_dim) * itemsize_x
    act_bytes = 2 * 4 * tile_b * (in_dim + h1_p + h2_p + out_dim)
    vmem_needed = io_bytes + 2 * weight_bytes + act_bytes + (4 << 20)
    vmem_cap = _vmem_capacity_bytes()
    vmem_limit = int(max(min(max(vmem_needed, 32 << 20), vmem_cap - (8 << 20)),
                         16 << 20))

    flops = 2 * B * (in_dim * h1_p + h1_p * h2_p + h2_p * out_dim)
    bytes_accessed = itemsize_x * B * (in_dim + out_dim) + weight_bytes

    def resident(shape):
        # Same block every grid step -> stays VMEM-resident, no re-DMA.
        # TODO(synk): with large real dims, pipeline_mode=pl.Buffered(1) here
        # would halve the resident-weight footprint under v7x's 64 MiB VMEM.
        return pl.BlockSpec(shape, lambda i: (0, 0))

    out = pl.pallas_call(
        _mlp_kernel,
        out_shape=jax.ShapeDtypeStruct((B, out_dim), x.dtype),
        grid=grid,
        in_specs=[
            pl.BlockSpec((tile_b, in_dim), lambda i: (i, 0)),
            resident(w1.shape), resident(b1.shape),
            resident(w2.shape), resident(b2.shape),
            resident(w3.shape), resident(b3.shape),
        ],
        out_specs=pl.BlockSpec((tile_b, out_dim), lambda i: (i, 0)),
        compiler_params=pltpu.CompilerParams(
            dimension_semantics=("parallel",),
            vmem_limit_bytes=vmem_limit,
        ),
        cost_estimate=pl.CostEstimate(
            flops=flops, transcendentals=0, bytes_accessed=bytes_accessed),
    )(x2, w1, b1, w2, b2, w3, b3)

    return out.reshape(*lead_shape, out_dim)


def init_params(key, input_dim, output_dim):
    """PyTorch nn.Linear-style init: uniform(-1/sqrt(fan_in), 1/sqrt(fan_in))."""
    dims = [(input_dim, input_dim // 2),
            (input_dim // 2, input_dim // 4),
            (input_dim // 4, output_dim)]
    params = {}
    keys = jax.random.split(key, 6)
    for i, (fan_in, fan_out) in enumerate(dims):
        bound = 1.0 / (fan_in ** 0.5)
        params[f"w{i+1}"] = jax.random.uniform(
            keys[2 * i], (fan_out, fan_in), jnp.float32, -bound, bound)
        params[f"b{i+1}"] = jax.random.uniform(
            keys[2 * i + 1], (fan_out,), jnp.float32, -bound, bound)
    return params


if __name__ == "__main__":
    batch = 8
    input_dim = 32
    output_dim = 8

    key = jax.random.PRNGKey(0)
    k_x, k_p = jax.random.split(key)
    x = jax.random.normal(k_x, (batch, input_dim), jnp.float32)
    params = init_params(k_p, input_dim, output_dim)

    # Pure-JAX reference (matches the PyTorch module).
    def ref(x, p):
        h = jnp.maximum(x @ p["w1"].T + p["b1"], 0.0)
        h = jnp.maximum(h @ p["w2"].T + p["b2"], 0.0)
        return h @ p["w3"].T + p["b3"]

    prep = prepare_params(params)          # one-time transpose + pad
    out = mlp_forward(x, prep)
    jax.block_until_ready(out)
    assert out.shape == (batch, output_dim)
    assert jnp.allclose(out, ref(x, params), atol=1e-5, rtol=1e-5)

    # Ragged batches (not multiples of the tile size / of 8) exercise the
    # cdiv grid + masked edge block.
    for b in (13, 1000):
        xb = jax.random.normal(jax.random.fold_in(k_x, b), (b, input_dim),
                               jnp.float32)
        ob = mlp_forward(xb, prep)
        jax.block_until_ready(ob)
        assert ob.shape == (b, output_dim)
        assert jnp.allclose(ob, ref(xb, params), atol=1e-5, rtol=1e-5)

    # bf16 MXU-operand path (v6e/v7x bandwidth option); accumulation stays f32.
    prep_bf16 = prepare_params(params, dtype=jnp.bfloat16)
    xb = jax.random.normal(jax.random.fold_in(k_x, 7), (257, input_dim),
                           jnp.float32)
    ob = mlp_forward(xb, prep_bf16)
    jax.block_until_ready(ob)
    assert ob.shape == (257, output_dim)
    assert jnp.allclose(ob, ref(xb, params), atol=0.1, rtol=0.1)

    print("KERNEL_OK")
</pallas_src>

<mosaic_0001>
module attributes {stable_mosaic.version = 11 : i64} {
  func.func @_mlp_kernel(%arg0: i32, %arg1: memref<8x32xf32, #tpu.memory_space<vmem>>, %arg2: memref<32x128xf32, #tpu.memory_space<vmem>>, %arg3: memref<1x128xf32, #tpu.memory_space<vmem>>, %arg4: memref<128x128xf32, #tpu.memory_space<vmem>>, %arg5: memref<1x128xf32, #tpu.memory_space<vmem>>, %arg6: memref<128x8xf32, #tpu.memory_space<vmem>>, %arg7: memref<1x8xf32, #tpu.memory_space<vmem>>, %arg8: memref<8x8xf32, #tpu.memory_space<vmem>>) attributes {dimension_semantics = [#tpu.dimension_semantics<parallel>], iteration_bounds = array<i64: 1>, scalar_prefetch = 0 : i64, scratch_operands = 0 : i64, tpu.core_type = #tpu.core_type<tc>, window_params = [{transform_indices = @transform_0, window_bounds = array<i64: 8, 32>}, {pipeline_mode = #tpu.pipeline_mode<synchronous>, transform_indices = @transform_1, window_bounds = array<i64: 32, 128>}, {pipeline_mode = #tpu.pipeline_mode<synchronous>, transform_indices = @transform_2, window_bounds = array<i64: 1, 128>}, {pipeline_mode = #tpu.pipeline_mode<synchronous>, transform_indices = @transform_3, window_bounds = array<i64: 128, 128>}, {pipeline_mode = #tpu.pipeline_mode<synchronous>, transform_indices = @transform_4, window_bounds = array<i64: 1, 128>}, {pipeline_mode = #tpu.pipeline_mode<synchronous>, transform_indices = @transform_5, window_bounds = array<i64: 128, 8>}, {pipeline_mode = #tpu.pipeline_mode<synchronous>, transform_indices = @transform_6, window_bounds = array<i64: 1, 8>}, {transform_indices = @transform_7, window_bounds = array<i64: 8, 8>}]} {
    %c0 = arith.constant 0 : index
    %c0_0 = arith.constant 0 : index
    %0 = vector.load %arg1[%c0, %c0_0] : memref<8x32xf32, #tpu.memory_space<vmem>>, vector<8x32xf32>
    %c0_1 = arith.constant 0 : index
    %c0_2 = arith.constant 0 : index
    %1 = vector.load %arg2[%c0_1, %c0_2] : memref<32x128xf32, #tpu.memory_space<vmem>>, vector<32x128xf32>
    %cst = arith.constant dense<0.000000e+00> : vector<8x128xf32>
    %2 = tpu.matmul %0, %1, %cst {dimension_numbers = #tpu.dot_dimension_numbers<[1], [0], [0], [1], [0, 0, 1, 1], [], []>} : vector<8x32xf32>, vector<32x128xf32>, vector<8x128xf32> -> vector<8x128xf32>
    %c0_3 = arith.constant 0 : index
    %c0_4 = arith.constant 0 : index
    %3 = vector.load %arg3[%c0_3, %c0_4] : memref<1x128xf32, #tpu.memory_space<vmem>>, vector<1x128xf32>
    %4 = vector.broadcast %3 : vector<1x128xf32> to vector<8x128xf32>
    %5 = arith.addf %2, %4 : vector<8x128xf32>
    %cst_5 = arith.constant 0.000000e+00 : f32
    %6 = vector.broadcast %cst_5 : f32 to vector<8x128xf32>
    %7 = arith.maximumf %5, %6 : vector<8x128xf32>
    %c0_6 = arith.constant 0 : index
    %c0_7 = arith.constant 0 : index
    %8 = vector.load %arg4[%c0_6, %c0_7] : memref<128x128xf32, #tpu.memory_space<vmem>>, vector<128x128xf32>
    %cst_8 = arith.constant dense<0.000000e+00> : vector<8x128xf32>
    %9 = tpu.matmul %7, %8, %cst_8 {dimension_numbers = #tpu.dot_dimension_numbers<[1], [0], [0], [1], [0, 0, 1, 1], [], []>} : vector<8x128xf32>, vector<128x128xf32>, vector<8x128xf32> -> vector<8x128xf32>
    %c0_9 = arith.constant 0 : index
    %c0_10 = arith.constant 0 : index
    %10 = vector.load %arg5[%c0_9, %c0_10] : memref<1x128xf32, #tpu.memory_space<vmem>>, vector<1x128xf32>
    %11 = vector.broadcast %10 : vector<1x128xf32> to vector<8x128xf32>
    %12 = arith.addf %9, %11 : vector<8x128xf32>
    %cst_11 = arith.constant 0.000000e+00 : f32
    %13 = vector.broadcast %cst_11 : f32 to vector<8x128xf32>
    %14 = arith.maximumf %12, %13 : vector<8x128xf32>
    %c0_12 = arith.constant 0 : index
    %c0_13 = arith.constant 0 : index
    %15 = vector.load %arg6[%c0_12, %c0_13] : memref<128x8xf32, #tpu.memory_space<vmem>>, vector<128x8xf32>
    %cst_14 = arith.constant dense<0.000000e+00> : vector<8x8xf32>
    %16 = tpu.matmul %14, %15, %cst_14 {dimension_numbers = #tpu.dot_dimension_numbers<[1], [0], [0], [1], [0, 0, 1, 1], [], []>} : vector<8x128xf32>, vector<128x8xf32>, vector<8x8xf32> -> vector<8x8xf32>
    %c0_15 = arith.constant 0 : index
    %c0_16 = arith.constant 0 : index
    %17 = vector.load %arg7[%c0_15, %c0_16] : memref<1x8xf32, #tpu.memory_space<vmem>>, vector<1x8xf32>
    %18 = vector.broadcast %17 : vector<1x8xf32> to vector<8x8xf32>
    %19 = arith.addf %16, %18 : vector<8x8xf32>
    %c0_17 = arith.constant 0 : index
    %c0_18 = arith.constant 0 : index
    %20 = vector.load %arg8[%c0_17, %c0_18] : memref<8x8xf32, #tpu.memory_space<vmem>>, vector<8x8xf32>
    tpu.vector_store %arg8[%c0_17, %c0_18], %19 {strides = array<i32>} : memref<8x8xf32, #tpu.memory_space<vmem>>, vector<8x8xf32>,
    return
  }
  func.func @transform_0(%arg0: i32) -> (i32, i32) {
    %c0_i32 = arith.constant 0 : i32
    %c0_i32_0 = arith.constant 0 : i32
    return %arg0, %c0_i32 : i32, i32
  }
  func.func @transform_1(%arg0: i32) -> (i32, i32) {
    %c0_i32 = arith.constant 0 : i32
    %c0_i32_0 = arith.constant 0 : i32
    %c0_i32_1 = arith.constant 0 : i32
    return %c0_i32, %c0_i32_0 : i32, i32
  }
  func.func @transform_2(%arg0: i32) -> (i32, i32) {
    %c0_i32 = arith.constant 0 : i32
    %c0_i32_0 = arith.constant 0 : i32
    %c0_i32_1 = arith.constant 0 : i32
    return %c0_i32, %c0_i32_0 : i32, i32
  }
  func.func @transform_3(%arg0: i32) -> (i32, i32) {
    %c0_i32 = arith.constant 0 : i32
    %c0_i32_0 = arith.constant 0 : i32
    %c0_i32_1 = arith.constant 0 : i32
    return %c0_i32, %c0_i32_0 : i32, i32
  }
  func.func @transform_4(%arg0: i32) -> (i32, i32) {
    %c0_i32 = arith.constant 0 : i32
    %c0_i32_0 = arith.constant 0 : i32
    %c0_i32_1 = arith.constant 0 : i32
    return %c0_i32, %c0_i32_0 : i32, i32
  }
  func.func @transform_5(%arg0: i32) -> (i32, i32) {
    %c0_i32 = arith.constant 0 : i32
    %c0_i32_0 = arith.constant 0 : i32
    %c0_i32_1 = arith.constant 0 : i32
    return %c0_i32, %c0_i32_0 : i32, i32
  }
  func.func @transform_6(%arg0: i32) -> (i32, i32) {
    %c0_i32 = arith.constant 0 : i32
    %c0_i32_0 = arith.constant 0 : i32
    %c0_i32_1 = arith.constant 0 : i32
    return %c0_i32, %c0_i32_0 : i32, i32
  }
  func.func @transform_7(%arg0: i32) -> (i32, i32) {
    %c0_i32 = arith.constant 0 : i32
    %c0_i32_0 = arith.constant 0 : i32
    return %arg0, %c0_i32 : i32, i32
  }
}

</mosaic_0001>

<bundles_post_ra>
// kernel: mlp_forward.1
= control target key start
LH: loop header
LB: loop body
LE: loop exit
PB: predicated region body
PF: predicated region fallthrough
CT: control target
= control target key end

     0   :  { %12 = vsyncpa [#allocation3], 0  ;;  %s745_s0 = inlined_call_operand.vmem [shape: f32[8,32], index: 0, kind: input, shape index: {}]   ;;  %s746_s1 = inlined_call_operand.hbm [shape: f32[32,128], index: 1, kind: input, shape index: {}]   ;;  %s747_s2 = inlined_call_operand.vmem [shape: f32[1,128], index: 2, kind: input, shape index: {}]   ;;  %s748_s3 = inlined_call_operand.vmem [shape: f32[128,128], index: 3, kind: input, shape index: {}]   ;;  %s749_s4 = inlined_call_operand.vmem [shape: f32[1,128], index: 4, kind: input, shape index: {}]   ;;  %s750_s5 = inlined_call_operand.vmem [shape: f32[128,8], index: 5, kind: input, shape index: {}]   ;;  %s751_s6 = inlined_call_operand.hbm [shape: f32[1,8], index: 6, kind: input, shape index: {}]   ;;  %s752_s7 = inlined_call_operand.hbm [shape: f32[8,8], index: 7, kind: output, shape index: {}]  }
   0x1   :  { %13 = vsyncpa [#allocation6], 0 }
   0x2   :  { %14 = vsyncpa [#allocation4], 0  ;;  %s542_s24 = smov [#allocation2]  }
   0x3   :  { %s22_s25 = sshll.u32 %s542_s24, 4  ;;  %s23_s25 = int_to_ptr.vmem [resolvable:$true] %s22_s25 }
   0x4   :  { %s484_s26 = scalar_lea.vmem %s23_s25, 512  ;;  %p489_p1 = scmp.lt.s32.totalorder %s23_s25, %s23_s25 }
   0x5   :  { %p485_p0 = scmp.ne.s32.totalorder %s23_s25, %s484_s26  ;;  %p490_p2 = scmp.lt.s32.totalorder %s484_s26, %s484_s26 }
   0x7   :  { %p491_p3 = por %p490_p2, %p489_p1 }
   0x9   :  { %p492_p4 = pnand %p491_p3, %p485_p0 }
   0xb   :  { %495 = shalt.err (!%p492_p4)
}
   0xc   :  { %s543_s27 = smov 128   ;;  %s544_s28 = smov 8  }
   0xd   :  { %28 = dma.hbm_to_vmem [thread:$0]  %s746_s1, 512, %s23_s25, [#allocation3], %s543_s27, %s543_s27, %s544_s28  }
   0xe   :  { %s545_s8 = smov [#allocation5]  }
   0xf   :  { %s43_s9 = sshll.u32 %s545_s8, 4  ;;  %s44_s9 = int_to_ptr.vmem [resolvable:$true] %s43_s9 }
  0x10   :  { %s504_s10 = scalar_lea.vmem %s44_s9, 16  ;;  %s508_s11 = scalar_lea.vmem %s44_s9, 32 }
  0x11   :  { %p505_p5 = scmp.ne.s32.totalorder %s44_s9, %s504_s10  ;;  %p509_p6 = scmp.lt.s32.totalorder %s44_s9, %s44_s9 }
  0x12   :  { %p510_p7 = scmp.lt.s32.totalorder %s508_s11, %s504_s10 }
  0x14   :  { %p511_p8 = por %p510_p7, %p509_p6 }
  0x16   :  { %p512_p9 = pnand %p511_p8, %p505_p5 }
  0x18   :  { %515 = shalt.err (!%p512_p9)
}
  0x19   :  { %46 = dma.hbm_to_vmem [thread:$0]  %s751_s6, 16, %s44_s9, [#allocation6]  }
  0x1a   :  { %536 = dma.done.wait [#allocation3], 512  }
  0x1b   :  { %537 = vsyncadd [#allocation3], 4294966784 }
  0x1c   :  { %538 = dma.done.wait [#allocation6], 16  }
  0x1d   :  { %539 = vsyncadd [#allocation6], 4294967280  ;;  %v546_v0 = vmov 0.0   ;;  %vm547_vm0 = vmmov 0   ;;  %v57_v1 = vld [vmem:[#allocation2 + $0x18] sm:$0xff]  ;;  %v56_v2 = vld [vmem:[#allocation2 + $0x10] sm:$0xff] }
  0x1e   :  { %388 = vmatprep.subr.mxu0 %v546_v0  ;;  %396 = vmatprep.mubr.msk.f32.mxu0 %vm547_vm0, %v546_v0  ;;  %v155_v3 = vld [vmem:[%s748_s3 + $0x78] sm:$0xff]  ;;  %v55_v4 = vld [vmem:[#allocation2 + $0x8] sm:$0xff]  ;;  %v154_v5 = vld [vmem:[%s748_s3 + $0x70] sm:$0xff]  ;;  %vm65_vm1 = vcmask 261120   ;;  %s548_s26 = smov [#allocation7]   ;;  %vm327_vm2 = vcmask 64512  }
  0x1f   :  { %399 = vmatprep.subr.mxu1 %v546_v0  ;;  %431 = vmatprep.mubr.msk.f32.mxu1 %vm547_vm0, %v546_v0  ;;  %v153_v6 = vld [vmem:[%s748_s3 + $0x68] sm:$0xff]  ;;  %v54_v7 = vld [vmem:[#allocation2] sm:$0xff]  ;;  %v151_v10 = vld [vmem:[%s748_s3 + $0x58] sm:$0xff]  ;;  %s335_s27 = sshll.u32 %s548_s26, 4  ;;  %s336_s27 = int_to_ptr.vmem [resolvable:$true] %s335_s27 }
  0x20   :  { %389 = vmatpush3.msra.mxu0 %v57_v1  ;;  %400 = vmatpush3.msra.mxu1 %v155_v3  ;;  %v53_v8 = vld [vmem:[%s745_s0] sm:$0xff]  ;;  %v150_v11 = vld [vmem:[%s748_s3 + $0x50] sm:$0xff]  ;;  %v149_v12 = vld [vmem:[%s748_s3 + $0x48] sm:$0xff]  ;;  %p521_p11 = scmp.lt.s32.totalorder %s336_s27, %s336_s27 }
  0x21   :  { %390 = vmatprep.subr.mxu0 %v546_v0  ;;  %401 = vmatprep.subr.mxu1 %v546_v0  ;;  %v152_v9 = vld [vmem:[%s748_s3 + $0x60] sm:$0xff]  ;;  %v147_v14 = vld [vmem:[%s748_s3 + $0x38] sm:$0xff]  ;;  %v146_v15 = vld [vmem:[%s748_s3 + $0x30] sm:$0xff] }
  0x22   :  { %391 = vmatpush3.msra.mxu0 %v56_v2  ;;  %402 = vmatpush3.msra.mxu1 %v154_v5  ;;  %v148_v13 = vld [vmem:[%s748_s3 + $0x40] sm:$0xff]  ;;  %v145_v16 = vld [vmem:[%s748_s3 + $0x28] sm:$0xff]  ;;  %v143_v18 = vld [vmem:[%s748_s3 + $0x18] sm:$0xff] }
  0x23   :  { %392 = vmatprep.subr.mxu0 %v546_v0  ;;  %403 = vmatprep.subr.mxu1 %v546_v0  ;;  %v144_v17 = vld [vmem:[%s748_s3 + $0x20] sm:$0xff]  ;;  %v142_v19 = vld [vmem:[%s748_s3 + $0x10] sm:$0xff]  ;;  %v141_v20 = vld [vmem:[%s748_s3 + $0x8] sm:$0xff] }
  0x24   :  { %393 = vmatpush3.msra.mxu0 %v55_v4  ;;  %404 = vmatpush3.msra.mxu1 %v153_v6  ;;  %v140_v21 = vld [vmem:[%s748_s3] sm:$0xff]  ;;  %v249_v22 = vld [vmem:[%s750_s5 + $0x78] sm:$0xff]  ;;  %v248_v23 = vld [vmem:[%s750_s5 + $0x70] sm:$0xff] }
  0x25   :  { %394 = vmatprep.subr.mxu0 %v546_v0  ;;  %405 = vmatprep.subr.mxu1 %v546_v0  ;;  %v247_v24 = vld [vmem:[%s750_s5 + $0x68] sm:$0xff]  ;;  %v246_v25 = vld [vmem:[%s750_s5 + $0x60] sm:$0xff]  ;;  %v245_v26 = vld [vmem:[%s750_s5 + $0x58] sm:$0xff] }
  0x26   :  { %395 = vmatpush3.msra.mxu0 %v54_v7  ;;  %406 = vmatpush3.msra.mxu1 %v152_v9  ;;  %v244_v27 = vld [vmem:[%s750_s5 + $0x50] sm:$0xff]  ;;  %v243_v28 = vld [vmem:[%s750_s5 + $0x48] sm:$0xff]  ;;  %v242_v29 = vld [vmem:[%s750_s5 + $0x40] sm:$0xff] }
  0x27   :  { %397 = vmatmul.mubr.msk.f32.vlgmr.msra.gmra.mxu0 %vm65_vm1, %v53_v8  ;;  %407 = vmatprep.subr.mxu1 %v546_v0  ;;  %v241_v30 = vld [vmem:[%s750_s5 + $0x38] sm:$0xff]  ;;  %v240_v31 = vld [vmem:[%s750_s5 + $0x30] sm:$0xff]  ;;  %v239_v32 = vld [vmem:[%s750_s5 + $0x28] sm:$0xff] }
  0x28   :  { %434 = vmatprep.subr.mxu0 %v546_v0  ;;  %408 = vmatpush3.msra.mxu1 %v151_v10  ;;  %v238_v33 = vld [vmem:[%s750_s5 + $0x20] sm:$0xff]  ;;  %v237_v34 = vld [vmem:[%s750_s5 + $0x18] sm:$0xff]  ;;  %v236_v40 = vld [vmem:[%s750_s5 + $0x10] sm:$0xff] }
  0x29   :  { %466 = vmatprep.mubr.msk.f32.mxu0 %vm547_vm0, %v546_v0  ;;  %409 = vmatprep.subr.mxu1 %v546_v0  ;;  %v345_v35 = vld [vmem:[%s747_s2] ss:$0 sm:$0xff]  ;;  %v235_v41 = vld [vmem:[%s750_s5 + $0x8] sm:$0xff] }
  0x2a   :  { %410 = vmatpush3.msra.mxu1 %v150_v11  ;;  %435 = vmatpush3.msra.mxu0 %v249_v22  ;;  %v234_v42 = vld [vmem:[%s750_s5] sm:$0xff]  ;;  %s516_s5 = scalar_lea.vmem %s336_s27, 128 }
  0x2b   :  { %411 = vmatprep.subr.mxu1 %v546_v0  ;;  %436 = vmatprep.subr.mxu0 %v546_v0  ;;  %v347_v43 = vld [vmem:[%s749_s4] ss:$0 sm:$0xff]  ;;  %p517_p10 = scmp.ne.s32.totalorder %s336_s27, %s516_s5  ;;  %p522_p12 = scmp.lt.s32.totalorder %s516_s5, %s516_s5 }
  0x2c   :  { %412 = vmatpush3.msra.mxu1 %v149_v12  ;;  %437 = vmatpush3.msra.mxu0 %v248_v23  ;;  %v348_v48 = vld [vmem:[#allocation5] ss:$0 sm:$0xff] }
  0x2d   :  { %413 = vmatprep.subr.mxu1 %v546_v0  ;;  %438 = vmatprep.subr.mxu0 %v546_v0  ;;  %p523_p13 = por %p522_p12, %p521_p11 }
  0x2e   :  { %414 = vmatpush3.msra.mxu1 %v148_v13  ;;  %439 = vmatpush3.msra.mxu0 %v247_v24 }
  0x2f   :  { %415 = vmatprep.subr.mxu1 %v546_v0  ;;  %440 = vmatprep.subr.mxu0 %v546_v0  ;;  %p524_p0 = pnand %p523_p13, %p517_p10 }
  0x30   :  { %416 = vmatpush3.msra.mxu1 %v147_v14  ;;  %441 = vmatpush3.msra.mxu0 %v246_v25 }
  0x31   :  { %417 = vmatprep.subr.mxu1 %v546_v0  ;;  %442 = vmatprep.subr.mxu0 %v546_v0 }
  0x32   :  { %418 = vmatpush3.msra.mxu1 %v146_v15  ;;  %443 = vmatpush3.msra.mxu0 %v245_v26 }
  0x33   :  { %419 = vmatprep.subr.mxu1 %v546_v0  ;;  %444 = vmatprep.subr.mxu0 %v546_v0 }
  0x34   :  { %420 = vmatpush3.msra.mxu1 %v145_v16  ;;  %445 = vmatpush3.msra.mxu0 %v244_v27 }
  0x35   :  { %421 = vmatprep.subr.mxu1 %v546_v0  ;;  %446 = vmatprep.subr.mxu0 %v546_v0 }
  0x36   :  { %422 = vmatpush3.msra.mxu1 %v144_v17  ;;  %447 = vmatpush3.msra.mxu0 %v243_v28 }
  0x37   :  { %423 = vmatprep.subr.mxu1 %v546_v0  ;;  %448 = vmatprep.subr.mxu0 %v546_v0 }
  0x38   :  { %424 = vmatpush3.msra.mxu1 %v143_v18  ;;  %449 = vmatpush3.msra.mxu0 %v242_v29 }
  0x39   :  { %425 = vmatprep.subr.mxu1 %v546_v0  ;;  %450 = vmatprep.subr.mxu0 %v546_v0 }
  0x3a   :  { %426 = vmatpush3.msra.mxu1 %v142_v19  ;;  %451 = vmatpush3.msra.mxu0 %v241_v30 }
  0x3b   :  { %427 = vmatprep.subr.mxu1 %v546_v0  ;;  %452 = vmatprep.subr.mxu0 %v546_v0 }
  0x3c   :  { %428 = vmatpush3.msra.mxu1 %v141_v20  ;;  %453 = vmatpush3.msra.mxu0 %v240_v31 }
  0x3d   :  { %429 = vmatprep.subr.mxu1 %v546_v0  ;;  %454 = vmatprep.subr.mxu0 %v546_v0 }
  0x3e   :  { %430 = vmatpush3.msra.mxu1 %v140_v21  ;;  %455 = vmatpush3.msra.mxu0 %v239_v32 }
  0x3f   :  { %456 = vmatprep.subr.mxu0 %v546_v0 }
  0x40   :  { %457 = vmatpush3.msra.mxu0 %v238_v33 }
  0x41   :  { %458 = vmatprep.subr.mxu0 %v546_v0 }
  0x42   :  { %459 = vmatpush3.msra.mxu0 %v237_v34 }
  0x43   :  { %460 = vmatprep.subr.mxu0 %v546_v0 }
  0x44   :  { %461 = vmatpush3.msra.mxu0 %v236_v40 }
  0x45   :  { %462 = vmatprep.subr.mxu0 %v546_v0 }
  0x46   :  { %463 = vmatpush3.msra.mxu0 %v235_v41 }
  0x47   :  { %464 = vmatprep.subr.mxu0 %v546_v0 }
  0x48   :  { %465 = vmatpush3.msra.mxu0 %v234_v42 }
  0xe7   :  { %v135_v36 = vpop.f32.mrf.mxu0 }
  0xe8   :  { %v136_v37 = vadd.f32 %v345_v35, %v135_v36 }
  0xe9   :  { %v398_v38 = vpop.f32.mrf.mxu0 }
  0xea   :  { %v139_v39 = vmax.f32 %v136_v37, 0.0 }
  0xec   :  { %432 = vmatmul.mubr.f32.vlgmr.msra.gmra.mxu1 %v139_v39 }
 0x1ac   :  { %v229_v44 = vpop.f32.mrf.mxu1 }
 0x1ad   :  { %v230_v45 = vadd.f32 %v347_v43, %v229_v44 }
 0x1ae   :  { %v433_v46 = vpop.f32.mrf.mxu1 }
 0x1af   :  { %v233_v47 = vmax.f32 %v230_v45, 0.0 }
 0x1b1   :  { %467 = vmatmul.mubr.f32.vlgmr.msra.gmra.mxu0 %v233_v47 }
 0x271   :  { %v323_v49 = vpop.f32.mrf.mxu0 }
 0x272   :  { %v324_v50 = vadd.f32 %v348_v48, %v323_v49 }
 0x273   :  { %v468_v51 = vpop.f32.mrf.mxu0 }
 0x274   :  { %328 = vst.msk [vmem:[#allocation7] sm:$0xff] %vm327_vm2, %v324_v50 }
 0x275   :  { %527 = shalt.err (!%p524_p0)
}
 0x276   :  { %338 = dma.vmem_to_hbm [thread:$0]  %s336_s27, 128, %s752_s7, [#allocation4]  }
 0x277   :  { %540 = dma.done.wait [#allocation4], 128  }
 0x278   :  { %541 = vsyncadd [#allocation4], 4294967168 }
 0x279   :  { %342 = vsyncpa [#allocation3], 1 }
 0x27a   :  { %343 = vsyncpa [#allocation6], 1 }
 0x27b   :  { %344 = vsyncpa [#allocation4], 1 }

</bundles_post_ra>
